<compile_context>
chip_gen: v7x
topology: tpu7x:2x2x1
jax: 0.10.0
libtpu: 0.0.40
codegen_flags: <defaults>
</compile_context>

<pallas_src>
import jax
import jax.numpy as jnp
from jax import lax
from jax.experimental import pallas as pl
from jax.experimental.pallas import tpu as pltpu


def hdnet_kernel(x_ref, w1_ref, b1_ref, w2_ref, w1s_ref, o_ref):
    # x: (TB, D), w1: (H, D), b1/w2: (1, H), w1_sym: (H, D), o: (TB, D)
    x = x_ref[...]
    w1 = w1_ref[...]

    # h = x @ W1^T via NT dot_general (contract both on D): no transpose needed.
    h = lax.dot_general(
        x, w1,
        dimension_numbers=(((1,), (1,)), ((), ())),
        preferred_element_type=jnp.float32,
    ) + b1_ref[...]                                   # (TB, H), f32 accumulate
    t = jnp.tanh(h)                                   # EUP

    # dH/dh for H = w2 . tanh(h) + b2:  (1 - tanh^2) * w2   (VPU, f32)
    g = (1.0 - t * t) * w2_ref[...]                   # (TB, H)

    # Chain rule through the first Linear with the symplectic swap folded into
    # the weight: out = cat(dp, -dq) = g @ W1_sym.  Single lane-dense store.
    o_ref[...] = jnp.dot(
        g.astype(w1s_ref.dtype), w1s_ref[...],
        preferred_element_type=jnp.float32,
    ).astype(o_ref.dtype)


def prepare_hdnet_params(w1, b1, w2, *, use_bf16=False):
    """One-time parameter prep (hoisted out of the per-ODE-step path).

    Builds W1_sym = cat(W1[:, d:], -W1[:, :d], axis=1) so that
    g @ W1_sym == cat(dp, -dq), and reshapes bias / readout vectors to 2-D
    (TPU wants >=2-D operands).  Bias and readout stay f32 for accuracy.
    """
    H, D = w1.shape
    d = D // 2
    w1_sym = jnp.concatenate([w1[:, d:], -w1[:, :d]], axis=1)   # (H, D)
    b1_2d = b1.reshape(1, H).astype(jnp.float32)
    w2_2d = w2.reshape(1, H).astype(jnp.float32)
    mm_dtype = jnp.bfloat16 if use_bf16 else jnp.float32        # v6e/v7x MXU lever
    return (w1.astype(mm_dtype), b1_2d, w2_2d, w1_sym.astype(mm_dtype))


def hdnet_forward(t, x, params, *, block_b=512):
    """HDNet.forward(t, x).  `t` is the ODE time, unused (as in the module)."""
    del t
    w1, b1_2d, w2_2d, w1_sym = params
    B, D = x.shape
    H = w1.shape[0]

    # Batch tile: sublane-aligned (multiple of 8), big enough to amortize the
    # ~0.35us per-grid-step overhead, small enough to stay well inside VMEM.
    tb = min(block_b, max(8, B))
    tb = ((tb + 7) // 8) * 8
    b_pad = pl.cdiv(B, tb) * tb
    x_in = x.astype(w1.dtype)
    if b_pad != B:
        x_in = jnp.pad(x_in, ((0, b_pad - B), (0, 0)))

    out = pl.pallas_call(
        hdnet_kernel,
        out_shape=jax.ShapeDtypeStruct((b_pad, D), jnp.float32),
        grid_spec=pltpu.PrefetchScalarGridSpec(
            num_scalar_prefetch=0,
            grid=(b_pad // tb,),
            in_specs=[
                pl.BlockSpec((tb, D), lambda i: (i, 0)),   # x: tiled over batch
                pl.BlockSpec((H, D), lambda i: (0, 0)),    # W1: VMEM-resident
                pl.BlockSpec((1, H), lambda i: (0, 0)),    # b1: VMEM-resident
                pl.BlockSpec((1, H), lambda i: (0, 0)),    # w2: VMEM-resident
                pl.BlockSpec((H, D), lambda i: (0, 0)),    # W1_sym: VMEM-resident
            ],
            out_specs=pl.BlockSpec((tb, D), lambda i: (i, 0)),
        ),
        compiler_params=pltpu.CompilerParams(
            dimension_semantics=("parallel",),
        ),
    )(x_in, w1, b1_2d, w2_2d, w1_sym)

    if b_pad != B:
        out = out[:B]
    return out


def hdnet_reference(x, w1, b1, w2):
    """Pure-JAX reference mirroring the PyTorch autograd semantics."""
    def hamiltonian_sum(z):
        h = jnp.tanh(z @ w1.T + b1)              # (B, H)
        return jnp.sum(h @ w2.reshape(-1, 1))    # sum of per-sample H
    dH = jax.grad(hamiltonian_sum)(x)
    half = x.shape[1] // 2
    dq, dp = dH[:, :half], dH[:, half:]
    return jnp.concatenate([dp, -dq], axis=1)


if __name__ == "__main__":
    B = 8            # batch
    d = 16           # dim of q (and of p)
    D = 2 * d        # phase-space dim
    HID = 32         # hnet hidden width

    key = jax.random.PRNGKey(0)
    kx, k1, k2, k3 = jax.random.split(key, 4)

    x = jax.random.normal(kx, (B, D), dtype=jnp.float32)
    w1 = 0.3 * jax.random.normal(k1, (HID, D), dtype=jnp.float32)   # Linear(D -> HID).weight
    b1 = 0.1 * jax.random.normal(k2, (HID,), dtype=jnp.float32)     # Linear(D -> HID).bias
    w2 = 0.3 * jax.random.normal(k3, (HID,), dtype=jnp.float32)     # Linear(HID -> 1).weight
    t_ode = jnp.float32(0.0)  # ODE time argument (unused by HDNet.forward)

    # Parameter prep is done once, outside the per-step path.
    params = prepare_hdnet_params(w1, b1, w2, use_bf16=False)

    out = hdnet_forward(t_ode, x, params)
    out = jax.block_until_ready(out)

    ref = hdnet_reference(x, w1, b1, w2)
    assert out.shape == (B, D)
    assert jnp.allclose(out, ref, atol=1e-5, rtol=1e-5), "mismatch vs JAX reference"

    print("KERNEL_OK")
</pallas_src>

<mosaic_0001>
module attributes {stable_mosaic.version = 11 : i64} {
  func.func @hdnet_kernel(%arg0: i32, %arg1: memref<8x32xf32, #tpu.memory_space<vmem>>, %arg2: memref<32x32xf32, #tpu.memory_space<vmem>>, %arg3: memref<1x32xf32, #tpu.memory_space<vmem>>, %arg4: memref<1x32xf32, #tpu.memory_space<vmem>>, %arg5: memref<32x32xf32, #tpu.memory_space<vmem>>, %arg6: memref<8x32xf32, #tpu.memory_space<vmem>>) attributes {dimension_semantics = [#tpu.dimension_semantics<parallel>], iteration_bounds = array<i64: 1>, scalar_prefetch = 0 : i64, scratch_operands = 0 : i64, tpu.core_type = #tpu.core_type<tc>, window_params = [{transform_indices = @transform_0, window_bounds = array<i64: 8, 32>}, {pipeline_mode = #tpu.pipeline_mode<synchronous>, transform_indices = @transform_1, window_bounds = array<i64: 32, 32>}, {pipeline_mode = #tpu.pipeline_mode<synchronous>, transform_indices = @transform_2, window_bounds = array<i64: 1, 32>}, {pipeline_mode = #tpu.pipeline_mode<synchronous>, transform_indices = @transform_3, window_bounds = array<i64: 1, 32>}, {pipeline_mode = #tpu.pipeline_mode<synchronous>, transform_indices = @transform_4, window_bounds = array<i64: 32, 32>}, {transform_indices = @transform_5, window_bounds = array<i64: 8, 32>}]} {
    %c0 = arith.constant 0 : index
    %c0_0 = arith.constant 0 : index
    %0 = vector.load %arg1[%c0, %c0_0] : memref<8x32xf32, #tpu.memory_space<vmem>>, vector<8x32xf32>
    %c0_1 = arith.constant 0 : index
    %c0_2 = arith.constant 0 : index
    %1 = vector.load %arg2[%c0_1, %c0_2] : memref<32x32xf32, #tpu.memory_space<vmem>>, vector<32x32xf32>
    %cst = arith.constant dense<0.000000e+00> : vector<8x32xf32>
    %2 = tpu.matmul %0, %1, %cst {dimension_numbers = #tpu.dot_dimension_numbers<[1], [1], [0], [0], [0, 0, 1, 0], [], []>} : vector<8x32xf32>, vector<32x32xf32>, vector<8x32xf32> -> vector<8x32xf32>
    %c0_3 = arith.constant 0 : index
    %c0_4 = arith.constant 0 : index
    %3 = vector.load %arg3[%c0_3, %c0_4] : memref<1x32xf32, #tpu.memory_space<vmem>>, vector<1x32xf32>
    %4 = vector.broadcast %3 : vector<1x32xf32> to vector<8x32xf32>
    %5 = arith.addf %2, %4 : vector<8x32xf32>
    %6 = math.tanh %5 : vector<8x32xf32>
    %7 = arith.mulf %6, %6 : vector<8x32xf32>
    %cst_5 = arith.constant 1.000000e+00 : f32
    %8 = vector.broadcast %cst_5 : f32 to vector<8x32xf32>
    %9 = arith.subf %8, %7 : vector<8x32xf32>
    %c0_6 = arith.constant 0 : index
    %c0_7 = arith.constant 0 : index
    %10 = vector.load %arg4[%c0_6, %c0_7] : memref<1x32xf32, #tpu.memory_space<vmem>>, vector<1x32xf32>
    %11 = vector.broadcast %10 : vector<1x32xf32> to vector<8x32xf32>
    %12 = arith.mulf %9, %11 : vector<8x32xf32>
    %c0_8 = arith.constant 0 : index
    %c0_9 = arith.constant 0 : index
    %13 = vector.load %arg5[%c0_8, %c0_9] : memref<32x32xf32, #tpu.memory_space<vmem>>, vector<32x32xf32>
    %cst_10 = arith.constant dense<0.000000e+00> : vector<8x32xf32>
    %14 = tpu.matmul %12, %13, %cst_10 {dimension_numbers = #tpu.dot_dimension_numbers<[1], [0], [0], [1], [0, 0, 1, 1], [], []>} : vector<8x32xf32>, vector<32x32xf32>, vector<8x32xf32> -> vector<8x32xf32>
    %c0_11 = arith.constant 0 : index
    %c0_12 = arith.constant 0 : index
    %15 = vector.load %arg6[%c0_11, %c0_12] : memref<8x32xf32, #tpu.memory_space<vmem>>, vector<8x32xf32>
    tpu.vector_store %arg6[%c0_11, %c0_12], %14 {strides = array<i32>} : memref<8x32xf32, #tpu.memory_space<vmem>>, vector<8x32xf32>,
    return
  }
  func.func @transform_0(%arg0: i32) -> (i32, i32) {
    %c0_i32 = arith.constant 0 : i32
    %c0_i32_0 = arith.constant 0 : i32
    return %arg0, %c0_i32 : i32, i32
  }
  func.func @transform_1(%arg0: i32) -> (i32, i32) {
    %c0_i32 = arith.constant 0 : i32
    %c0_i32_0 = arith.constant 0 : i32
    %c0_i32_1 = arith.constant 0 : i32
    return %c0_i32, %c0_i32_0 : i32, i32
  }
  func.func @transform_2(%arg0: i32) -> (i32, i32) {
    %c0_i32 = arith.constant 0 : i32
    %c0_i32_0 = arith.constant 0 : i32
    %c0_i32_1 = arith.constant 0 : i32
    return %c0_i32, %c0_i32_0 : i32, i32
  }
  func.func @transform_3(%arg0: i32) -> (i32, i32) {
    %c0_i32 = arith.constant 0 : i32
    %c0_i32_0 = arith.constant 0 : i32
    %c0_i32_1 = arith.constant 0 : i32
    return %c0_i32, %c0_i32_0 : i32, i32
  }
  func.func @transform_4(%arg0: i32) -> (i32, i32) {
    %c0_i32 = arith.constant 0 : i32
    %c0_i32_0 = arith.constant 0 : i32
    %c0_i32_1 = arith.constant 0 : i32
    return %c0_i32, %c0_i32_0 : i32, i32
  }
  func.func @transform_5(%arg0: i32) -> (i32, i32) {
    %c0_i32 = arith.constant 0 : i32
    %c0_i32_0 = arith.constant 0 : i32
    return %arg0, %c0_i32 : i32, i32
  }
}

</mosaic_0001>

<bundles_post_ra>
// kernel: tpu_custom_call.1
= control target key start
LH: loop header
LB: loop body
LE: loop exit
PB: predicated region body
PF: predicated region fallthrough
CT: control target
= control target key end

     0   :  { %10 = vsyncpa [#allocation3], 0  ;;  %s526_s0 = inlined_call_operand.hbm [shape: f32[8,32], index: 0, kind: input, shape index: {}]   ;;  %s527_s1 = inlined_call_operand.hbm [shape: f32[32,32], index: 1, kind: input, shape index: {}]   ;;  %s528_s2 = inlined_call_operand.vmem [shape: f32[1,32], index: 2, kind: input, shape index: {}]   ;;  %s529_s3 = inlined_call_operand.vmem [shape: f32[1,32], index: 3, kind: input, shape index: {}]   ;;  %s530_s4 = inlined_call_operand.hbm [shape: f32[32,32], index: 4, kind: input, shape index: {}]   ;;  %s531_s5 = inlined_call_operand.hbm [shape: f32[8,32], index: 5, kind: output, shape index: {}]  }
   0x1   :  { %11 = vsyncpa [#allocation6], 0 }
   0x2   :  { %12 = vsyncpa [#allocation4], 0  ;;  %s422_s18 = smov [#allocation5]   ;;  %s328_s22 = scalar_lea.hbm %s527_s1, 512 }
   0x3   :  { %s28_s19 = sshll.u32 %s422_s18, 4  ;;  %p329_p0 = scmp.ne.s32.totalorder %s527_s1, %s328_s22  ;;  %s29_s19 = int_to_ptr.vmem [resolvable:$true] %s28_s19 }
   0x4   :  { %p332_p1 = scmp.lt.u32.totalorder %s328_s22, %s527_s1 }
   0x6   :  { %p334_p2 = pnand %p332_p1, %p329_p0 }
   0x8   :  { %337 = shalt.err (!%p334_p2)
}
   0x9   :  { %s338_s27 = scalar_lea.vmem %s29_s19, 512  ;;  %p343_p4 = scmp.lt.s32.totalorder %s29_s19, %s29_s19 }
   0xa   :  { %p339_p3 = scmp.ne.s32.totalorder %s29_s19, %s338_s27  ;;  %p344_p5 = scmp.lt.s32.totalorder %s338_s27, %s338_s27 }
   0xc   :  { %p345_p6 = por %p344_p5, %p343_p4 }
   0xe   :  { %p346_p7 = pnand %p345_p6, %p339_p3 }
  0x10   :  { %349 = shalt.err (!%p346_p7)
}
  0x11   :  { %s423_s28 = smov 128   ;;  %s424_s29 = smov 8  }
  0x12   :  { %34 = dma.hbm_to_vmem [thread:$0]  %s527_s1, 512, %s29_s19, [#allocation6], %s423_s28, %s423_s28, %s424_s29  }
  0x13   :  { %s425_s7 = smov [#allocation2]   ;;  %s426_s9 = smov [#allocation7]  }
  0x14   :  { %s19_s8 = sshll.u32 %s425_s7, 4  ;;  %s44_s10 = sshll.u32 %s426_s9, 4  ;;  %s20_s8 = int_to_ptr.vmem [resolvable:$true] %s19_s8  ;;  %s45_s10 = int_to_ptr.vmem [resolvable:$true] %s44_s10 }
  0x15   :  { %s350_s13 = scalar_lea.hbm %s526_s0, 128 }
  0x16   :  { %p351_p8 = scmp.ne.s32.totalorder %s526_s0, %s350_s13  ;;  %p354_p9 = scmp.lt.u32.totalorder %s350_s13, %s526_s0 }
  0x18   :  { %p356_p10 = pnand %p354_p9, %p351_p8 }
  0x1a   :  { %359 = shalt.err (!%p356_p10)
}
  0x1b   :  { %s360_s1 = scalar_lea.vmem %s20_s8, 128  ;;  %p365_p12 = scmp.lt.s32.totalorder %s20_s8, %s20_s8 }
  0x1c   :  { %p361_p11 = scmp.ne.s32.totalorder %s20_s8, %s360_s1  ;;  %p366_p13 = scmp.lt.s32.totalorder %s360_s1, %s360_s1 }
  0x1e   :  { %p367_p0 = por %p366_p13, %p365_p12 }
  0x20   :  { %p368_p1 = pnand %p367_p0, %p361_p11 }
  0x22   :  { %371 = shalt.err (!%p368_p1)
}
  0x23   :  { %22 = dma.hbm_to_vmem [thread:$0]  %s526_s0, 128, %s20_s8, [#allocation3]  }
  0x24   :  { %s372_s22 = scalar_lea.hbm %s530_s4, 512 }
  0x25   :  { %p373_p2 = scmp.ne.s32.totalorder %s530_s4, %s372_s22  ;;  %p376_p3 = scmp.lt.u32.totalorder %s372_s22, %s530_s4 }
  0x27   :  { %p378_p4 = pnand %p376_p3, %p373_p2 }
  0x29   :  { %381 = shalt.err (!%p378_p4)
}
  0x2a   :  { %s382_s27 = scalar_lea.vmem %s45_s10, 512  ;;  %p387_p6 = scmp.lt.s32.totalorder %s45_s10, %s45_s10 }
  0x2b   :  { %p383_p5 = scmp.ne.s32.totalorder %s45_s10, %s382_s27  ;;  %p388_p7 = scmp.lt.s32.totalorder %s382_s27, %s382_s27 }
  0x2d   :  { %p389_p8 = por %p388_p7, %p387_p6 }
  0x2f   :  { %p390_p9 = pnand %p389_p8, %p383_p5 }
  0x31   :  { %393 = shalt.err (!%p390_p9)
}
  0x32   :  { %50 = dma.hbm_to_vmem [thread:$0]  %s530_s4, 512, %s45_s10, [#allocation6], %s423_s28, %s423_s28, %s424_s29  }
  0x33   :  { %416 = dma.done.wait [#allocation3], 128  }
  0x34   :  { %417 = vsyncadd [#allocation3], 4294967168 }
  0x35   :  { %418 = dma.done.wait [#allocation6], 1024  }
  0x36   :  { %419 = vsyncadd [#allocation6], 4294966272  ;;  %v427_v0 = vmov 0.0|0.0   ;;  %vm428_vm0 = vmmov 0   ;;  %v429_v1 = vmov 0.0   ;;  %vm72_vm1 = vcmask 261120  }
  0x37   :  { %303 = vmatprep.subr.bf16.mxu0 %v427_v0  ;;  %289 = vmatprep.mubr.msk.f32.mxu0 %vm428_vm0, %v429_v1  ;;  %v61_v2 = vld [vmem:[#allocation5] sm:$0xff]  ;;  %v62_v3 = vld [vmem:[#allocation5 + $0x8] sm:$0xff]  ;;  %vm305_vm2 = vmpackc.low %vm72_vm1, %vm72_vm1  ;;  %s430_s7 = smov [#allocation8]  }
  0x38   :  { %311 = vmatprep.subr.bf16.mxu1 %v427_v0  ;;  %300 = vmatprep.mubr.msk.f32.mxu1 %vm428_vm0, %v429_v1  ;;  %v304_v4 = vpack.c.bf16 %v62_v3, %v61_v2  ;;  %v63_v5 = vld [vmem:[#allocation5 + $0x10] sm:$0xff]  ;;  %v64_v6 = vld [vmem:[#allocation5 + $0x18] sm:$0xff]  ;;  %v169_v9 = vld [vmem:[#allocation7] sm:$0xff]  ;;  %s253_s8 = sshll.u32 %s430_s7, 4  ;;  %s254_s8 = int_to_ptr.vmem [resolvable:$true] %s253_s8 }
  0x39   :  { %v308_v7 = vpack.c.bf16 %v64_v6, %v63_v5  ;;  %v60_v8 = vld [vmem:[#allocation2] sm:$0xff]  ;;  %v170_v10 = vld [vmem:[#allocation7 + $0x8] sm:$0xff]  ;;  %v171_v12 = vld [vmem:[#allocation7 + $0x10] sm:$0xff]  ;;  %p399_p11 = scmp.lt.s32.totalorder %s254_s8, %s254_s8 }
  0x3a   :  { %306 = vmatpush3.bf16.xpose.msk.msra.mxu0 %vm305_vm2, %v304_v4  ;;  %v312_v11 = vpack.c.bf16 %v170_v10, %v169_v9  ;;  %v172_v13 = vld [vmem:[#allocation7 + $0x18] sm:$0xff] }
  0x3b   :  { %307 = vmatprep.subr.bf16.mxu0 %v427_v0  ;;  %v315_v14 = vpack.c.bf16 %v172_v13, %v171_v12  ;;  %v263_v15 = vld [vmem:[%s528_s2] ss:$0 sm:$0xff]  ;;  %s394_s2 = scalar_lea.vmem %s254_s8, 128 }
  0x3c   :  { %313 = vmatpush3.bf16.msra.mxu1 %v312_v11  ;;  %v269_v21 = vld [vmem:[%s529_s3] ss:$0 sm:$0xff]  ;;  %p395_p10 = scmp.ne.s32.totalorder %s254_s8, %s394_s2  ;;  %p400_p12 = scmp.lt.s32.totalorder %s394_s2, %s394_s2 }
  0x3d   :  { %314 = vmatprep.subr.bf16.mxu1 %v427_v0 }
  0x3e   :  { %p401_p13 = por %p400_p12, %p399_p11 }
  0x40   :  { %316 = vmatpush3.bf16.msra.mxu1 %v315_v14  ;;  %p402_p0 = pnand %p401_p13, %p395_p10 }
  0x42   :  { %310 = vmatpush3.bf16.xpose.msk.msra.mxu0 %vm305_vm2, %v308_v7 }
  0x49   :  { %290 = vmatmul.mubr.msk.f32.vlgmr.msra.gmra.mrb[0].mxu0 %vm72_vm1, %v60_v8 }
 0x11c   :  { %v154_v16 = vpop.f32.mrb[0].mxu0 }
 0x11d   :  { %v155_v17 = vadd.f32 %v263_v15, %v154_v16  ;;  %v291_v18 = vpop.f32.mrb[1].mxu0 }
 0x11f   :  { %326 = vtanh.f32 %v155_v17 }
 0x129   :  { %v327_v19 = vpop.eup %326 }
 0x12a   :  { %v159_v20 = vmul.f32 %v327_v19, %v327_v19 }
 0x12c   :  { %v160_v22 = vsub.f32 1.0, %v159_v20 }
 0x12e   :  { %v168_v23 = vmul.f32 %v269_v21, %v160_v22 }
 0x130   :  { %301 = vmatmul.mubr.msk.f32.vlgmr.msra.gmra.mrb[0].mxu1 %vm72_vm1, %v168_v23 }
 0x203   :  { %v242_v24 = vpop.f32.mrb[0].mxu1 }
 0x204   :  { %246 = vst.msk [vmem:[#allocation8] sm:$0xff] %vm72_vm1, %v242_v24  ;;  %v302_v25 = vpop.f32.mrb[1].mxu1 }
 0x205   :  { %405 = shalt.err (!%p402_p0)
}
 0x206   :  { %s406_s10 = scalar_lea.hbm %s531_s5, 128 }
 0x207   :  { %p407_p1 = scmp.ne.s32.totalorder %s531_s5, %s406_s10  ;;  %p410_p2 = scmp.lt.u32.totalorder %s406_s10, %s531_s5 }
 0x209   :  { %p412_p3 = pnand %p410_p2, %p407_p1 }
 0x20b   :  { %415 = shalt.err (!%p412_p3)
}
 0x20c   :  { %256 = dma.vmem_to_hbm [thread:$0]  %s254_s8, 128, %s531_s5, [#allocation4]  }
 0x20d   :  { %420 = dma.done.wait [#allocation4], 128  }
 0x20e   :  { %421 = vsyncadd [#allocation4], 4294967168 }
 0x20f   :  { %260 = vsyncpa [#allocation3], 1 }
 0x210   :  { %261 = vsyncpa [#allocation6], 1 }
 0x211   :  { %262 = vsyncpa [#allocation4], 1 }

</bundles_post_ra>
